<compile_context>
chip_gen: v6e
topology: v6e:2x2x1
jax: 0.10.0
libtpu: 0.0.40
codegen_flags: <defaults>
</compile_context>

<pallas_src>
import functools

import jax
import jax.numpy as jnp
from jax.experimental import pallas as pl
from jax.experimental.pallas import tpu as pltpu


def _layernorm_kernel(x_ref, gamma_ref, beta_ref, o_ref, *, inv_h, eps, use_mxu):
    x = x_ref[...].astype(jnp.float32)                       # (tile_rows, H)
    if use_mxu:
        # Offload both per-row reductions to the idle MXU (vector-extended
        # slot) so the cross-lane XLU path is not the bottleneck at small H.
        ones = jnp.ones((x.shape[-1], 1), jnp.float32)
        u = jnp.dot(x, ones, preferred_element_type=jnp.float32) * inv_h
        d = x - u
        s = jnp.dot(d * d, ones, preferred_element_type=jnp.float32) * inv_h
    else:
        u = jnp.sum(x, axis=-1, keepdims=True) * inv_h       # mean
        d = x - u
        s = jnp.sum(d * d, axis=-1, keepdims=True) * inv_h   # biased variance
    y = d * jax.lax.rsqrt(s + eps)                           # EUP rsqrt
    o_ref[...] = (gamma_ref[...] * y + beta_ref[...]).astype(o_ref.dtype)


def _vmem_capacity_bytes():
    """Physical VMEM of the attached TPU; conservative (v7x) fallback."""
    try:
        info = pltpu.get_tpu_info()
        cap = getattr(info, "vmem_capacity_bytes", None)
        if cap:
            return int(cap)
    except Exception:
        pass
    return 64 * 1024 * 1024  # v7x physical VMEM (smallest of v5e/v6e/v7x)


def _num_tensorcores():
    """TensorCores per chip; default 1 (safe: no forced grid split)."""
    try:
        info = pltpu.get_tpu_info()
        for attr in ("num_tensorcores", "num_cores", "tensorcore_count",
                     "cores_per_chip"):
            v = getattr(info, attr, None)
            if v:
                return int(v)
    except Exception:
        pass
    return 1


def _sublane_multiple(dtype):
    """Sublane packing multiple: 8 for f32, 16 for bf16, 32 for int8/fp8."""
    itemsize = jnp.dtype(dtype).itemsize
    return max(8, 32 // max(itemsize, 1))


def _round_up(n, m):
    return ((n + m - 1) // m) * m


def _pick_tile_rows(R, H, itemsize, vmem_limit, sub, n_cores,
                    target_bytes=8 * 1024 * 1024):
    """Largest row tile (multiple of `sub`) fitting the VMEM budget, capped by
    a per-step input-byte target (multi-MiB slabs amortize step overhead)."""
    budget = (vmem_limit * 3) // 4
    # Double-buffered in + out tiles at I/O dtype, plus live f32 temporaries
    # (x_f32, d, y ~= 12 B/elem for sub-f32 inputs; ~8 B/elem extra for f32).
    temp_bytes = 12 if itemsize < 4 else 8
    per_row = H * (4 * itemsize + temp_bytes)
    tile = budget // max(per_row, 1)
    # Cap by a byte target instead of a fixed row count.
    tile = min(tile, max(sub, target_bytes // max(H * itemsize, 1)))
    tile = max(sub, (tile // sub) * sub)
    # Never larger than the (sublane-rounded) row count.
    tile = min(tile, _round_up(R, sub))
    # Only split a fits-in-one-tile problem when the chip has >1 TensorCore,
    # and then into >= 2 steps per core so each core still pipelines its DMA.
    if n_cores >= 2 and tile >= R and R >= 2 * n_cores * sub:
        tile = max(sub, _round_up(pl.cdiv(R, 2 * n_cores), sub))
    return tile


def layer_norm(x, gamma, beta, variance_epsilon=1e-12, *, tile_rows=None):
    """LayerNorm over the last axis of x (any leading shape)."""
    orig_shape = x.shape
    H = orig_shape[-1]
    x2 = x.reshape(-1, H)
    R = x2.shape[0]
    itemsize = jnp.dtype(x.dtype).itemsize
    sub = _sublane_multiple(x.dtype)

    vmem = _vmem_capacity_bytes()
    # Raise the scoped VMEM limit past the 16/32 MiB default, stay below v7x's
    # 64 MiB physical VMEM (and leave headroom on every generation).
    vmem_limit = max(32 * 1024 * 1024,
                     min(vmem - 16 * 1024 * 1024, 100 * 1024 * 1024))

    if tile_rows is None:
        tile_rows = _pick_tile_rows(R, H, itemsize, vmem_limit, sub,
                                    _num_tensorcores())
    grid = pl.cdiv(R, tile_rows)

    # Cast params once here instead of every grid step inside the kernel.
    gamma2 = gamma.reshape(1, H).astype(jnp.float32)
    beta2 = beta.reshape(1, H).astype(jnp.float32)

    kernel = functools.partial(
        _layernorm_kernel,
        inv_h=1.0 / float(H),
        eps=float(variance_epsilon),
        use_mxu=(H <= 512),   # small-H: reductions to MXU, else XLU is fine
    )

    out = pl.pallas_call(
        kernel,
        out_shape=jax.ShapeDtypeStruct((R, H), x.dtype),
        grid_spec=pltpu.PrefetchScalarGridSpec(
            num_scalar_prefetch=0,
            grid=(grid,),
            in_specs=[
                pl.BlockSpec((tile_rows, H), lambda i: (i, 0)),
                pl.BlockSpec((1, H), lambda i: (0, 0)),
                pl.BlockSpec((1, H), lambda i: (0, 0)),
            ],
            out_specs=pl.BlockSpec((tile_rows, H), lambda i: (i, 0)),
        ),
        compiler_params=pltpu.CompilerParams(
            dimension_semantics=("parallel",),
            vmem_limit_bytes=vmem_limit,
        ),
    )(x2, gamma2, beta2)

    return out.reshape(orig_shape)


def _reference(x, gamma, beta, eps):
    xf = x.astype(jnp.float32)
    u = jnp.mean(xf, axis=-1, keepdims=True)
    s = jnp.mean((xf - u) ** 2, axis=-1, keepdims=True)
    y = gamma.astype(jnp.float32) * ((xf - u) / jnp.sqrt(s + eps)) \
        + beta.astype(jnp.float32)
    return y.astype(x.dtype)


if __name__ == "__main__":
    key = jax.random.PRNGKey(0)
    k_x, k_g, k_b, k_x2, k_x3 = jax.random.split(key, 5)

    # Shapes consistent with the module; H=128 keeps the lane dim dense.
    B, S, H = 2, 8, 128
    x = jax.random.normal(k_x, (B, S, H), dtype=jnp.float32)
    # Module init is ones/zeros; perturb slightly so the affine path is tested.
    gamma = jnp.ones((H,), jnp.float32) + 0.1 * jax.random.normal(k_g, (H,), jnp.float32)
    beta = 0.1 * jax.random.normal(k_b, (H,), jnp.float32)
    eps = 1e-12  # matches the module's default variance_epsilon

    y = layer_norm(x, gamma, beta, variance_epsilon=eps)
    jax.block_until_ready(y)
    ref = _reference(x, gamma, beta, eps)
    assert jnp.allclose(y, ref, atol=1e-5, rtol=1e-5), "mismatch vs reference"

    # Second shape exercises the ragged (non-divisible) final row block.
    x2 = jax.random.normal(k_x2, (3, 5, H), dtype=jnp.float32)
    y2 = layer_norm(x2, gamma, beta, variance_epsilon=eps)
    jax.block_until_ready(y2)
    ref2 = _reference(x2, gamma, beta, eps)
    assert jnp.allclose(y2, ref2, atol=1e-5, rtol=1e-5), "ragged-block mismatch"

    # bf16 I/O exercises the dtype-aware sublane rounding path.
    x3 = jax.random.normal(k_x3, (B, S, H), dtype=jnp.float32).astype(jnp.bfloat16)
    y3 = layer_norm(x3, gamma, beta, variance_epsilon=eps)
    jax.block_until_ready(y3)
    ref3 = _reference(x3, gamma, beta, eps)
    assert jnp.allclose(y3.astype(jnp.float32), ref3.astype(jnp.float32),
                        atol=3e-2, rtol=3e-2), "bf16 mismatch"

    print("KERNEL_OK")
</pallas_src>

<mosaic_0001>
module attributes {stable_mosaic.version = 11 : i64} {
  func.func @_layernorm_kernel(%arg0: i32, %arg1: memref<16x128xf32, #tpu.memory_space<vmem>>, %arg2: memref<1x128xf32, #tpu.memory_space<vmem>>, %arg3: memref<1x128xf32, #tpu.memory_space<vmem>>, %arg4: memref<16x128xf32, #tpu.memory_space<vmem>>) attributes {dimension_semantics = [#tpu.dimension_semantics<parallel>], iteration_bounds = array<i64: 1>, scalar_prefetch = 0 : i64, scratch_operands = 0 : i64, tpu.core_type = #tpu.core_type<tc>, window_params = [{transform_indices = @transform_0, window_bounds = array<i64: 16, 128>}, {pipeline_mode = #tpu.pipeline_mode<synchronous>, transform_indices = @transform_1, window_bounds = array<i64: 1, 128>}, {pipeline_mode = #tpu.pipeline_mode<synchronous>, transform_indices = @transform_2, window_bounds = array<i64: 1, 128>}, {transform_indices = @transform_3, window_bounds = array<i64: 16, 128>}]} {
    %c0 = arith.constant 0 : index
    %c0_0 = arith.constant 0 : index
    %0 = vector.load %arg1[%c0, %c0_0] : memref<16x128xf32, #tpu.memory_space<vmem>>, vector<16x128xf32>
    %cst = arith.constant 1.000000e+00 : f32
    %1 = vector.broadcast %cst : f32 to vector<128x1xf32>
    %cst_1 = arith.constant dense<0.000000e+00> : vector<16x1xf32>
    %2 = tpu.matmul %0, %1, %cst_1 {dimension_numbers = #tpu.dot_dimension_numbers<[1], [0], [0], [1], [0, 0, 1, 1], [], []>} : vector<16x128xf32>, vector<128x1xf32>, vector<16x1xf32> -> vector<16x1xf32>
    %cst_2 = arith.constant 7.812500e-03 : f32
    %3 = vector.broadcast %cst_2 : f32 to vector<16x1xf32>
    %4 = arith.mulf %2, %3 : vector<16x1xf32>
    %5 = vector.broadcast %4 : vector<16x1xf32> to vector<16x128xf32>
    %6 = arith.subf %0, %5 : vector<16x128xf32>
    %7 = arith.mulf %6, %6 : vector<16x128xf32>
    %cst_3 = arith.constant dense<0.000000e+00> : vector<16x1xf32>
    %8 = tpu.matmul %7, %1, %cst_3 {dimension_numbers = #tpu.dot_dimension_numbers<[1], [0], [0], [1], [0, 0, 1, 1], [], []>} : vector<16x128xf32>, vector<128x1xf32>, vector<16x1xf32> -> vector<16x1xf32>
    %cst_4 = arith.constant 7.812500e-03 : f32
    %9 = vector.broadcast %cst_4 : f32 to vector<16x1xf32>
    %10 = arith.mulf %8, %9 : vector<16x1xf32>
    %cst_5 = arith.constant 9.99999996E-13 : f32
    %11 = vector.broadcast %cst_5 : f32 to vector<16x1xf32>
    %12 = arith.addf %10, %11 : vector<16x1xf32>
    %13 = math.rsqrt %12 : vector<16x1xf32>
    %14 = vector.broadcast %13 : vector<16x1xf32> to vector<16x128xf32>
    %15 = arith.mulf %6, %14 : vector<16x128xf32>
    %c0_6 = arith.constant 0 : index
    %c0_7 = arith.constant 0 : index
    %16 = vector.load %arg2[%c0_6, %c0_7] : memref<1x128xf32, #tpu.memory_space<vmem>>, vector<1x128xf32>
    %17 = vector.broadcast %16 : vector<1x128xf32> to vector<16x128xf32>
    %18 = arith.mulf %17, %15 : vector<16x128xf32>
    %c0_8 = arith.constant 0 : index
    %c0_9 = arith.constant 0 : index
    %19 = vector.load %arg3[%c0_8, %c0_9] : memref<1x128xf32, #tpu.memory_space<vmem>>, vector<1x128xf32>
    %20 = vector.broadcast %19 : vector<1x128xf32> to vector<16x128xf32>
    %21 = arith.addf %18, %20 : vector<16x128xf32>
    %c0_10 = arith.constant 0 : index
    %c0_11 = arith.constant 0 : index
    %22 = vector.load %arg4[%c0_10, %c0_11] : memref<16x128xf32, #tpu.memory_space<vmem>>, vector<16x128xf32>
    tpu.vector_store %arg4[%c0_10, %c0_11], %21 {strides = array<i32>} : memref<16x128xf32, #tpu.memory_space<vmem>>, vector<16x128xf32>,
    return
  }
  func.func @transform_0(%arg0: i32) -> (i32, i32) {
    %c0_i32 = arith.constant 0 : i32
    %c0_i32_0 = arith.constant 0 : i32
    return %arg0, %c0_i32 : i32, i32
  }
  func.func @transform_1(%arg0: i32) -> (i32, i32) {
    %c0_i32 = arith.constant 0 : i32
    %c0_i32_0 = arith.constant 0 : i32
    %c0_i32_1 = arith.constant 0 : i32
    return %c0_i32, %c0_i32_0 : i32, i32
  }
  func.func @transform_2(%arg0: i32) -> (i32, i32) {
    %c0_i32 = arith.constant 0 : i32
    %c0_i32_0 = arith.constant 0 : i32
    %c0_i32_1 = arith.constant 0 : i32
    return %c0_i32, %c0_i32_0 : i32, i32
  }
  func.func @transform_3(%arg0: i32) -> (i32, i32) {
    %c0_i32 = arith.constant 0 : i32
    %c0_i32_0 = arith.constant 0 : i32
    return %arg0, %c0_i32 : i32, i32
  }
}

</mosaic_0001>

<bundles_post_ra>
// kernel: tpu_custom_call.1
= control target key start
LH: loop header
LB: loop body
LE: loop exit
PB: predicated region body
PF: predicated region fallthrough
CT: control target
= control target key end

     0   :  { %8 = vsyncpa [#allocation3], 0  ;;  %s528_s0 = inlined_call_operand.hbm [shape: f32[16,128], index: 0, kind: input, shape index: {}]   ;;  %s529_s1 = inlined_call_operand.vmem [shape: f32[1,128], index: 1, kind: input, shape index: {}]   ;;  %s530_s2 = inlined_call_operand.vmem [shape: f32[1,128], index: 2, kind: input, shape index: {}]   ;;  %s531_s3 = inlined_call_operand.hbm [shape: f32[16,128], index: 3, kind: output, shape index: {}]  }
   0x1   :  { %9 = vsyncpa [#allocation4], 0  ;;  %s416_s12 = smov [#allocation2]  }
   0x2   :  { %s15_s13 = sshll.u32 %s416_s12, 4  ;;  %s16_s13 = int_to_ptr.vmem [resolvable:$true] %s15_s13 }
   0x3   :  { %s380_s14 = scalar_lea.vmem %s16_s13, 256  ;;  %p385_p1 = scmp.lt.s32.totalorder %s16_s13, %s16_s13 }
   0x4   :  { %p381_p0 = scmp.ne.s32.totalorder %s16_s13, %s380_s14  ;;  %p386_p2 = scmp.lt.s32.totalorder %s380_s14, %s380_s14 }
   0x6   :  { %p387_p3 = por %p386_p2, %p385_p1 }
   0x8   :  { %p388_p4 = pnand %p387_p3, %p381_p0 }
   0xa   :  { %391 = shalt.err (!%p388_p4)
}
   0xb   :  { %s417_s15 = smov 128   ;;  %s418_s16 = smov 8  }
   0xc   :  { %21 = dma.hbm_to_vmem [thread:$0]  %s528_s0, 256, %s16_s13, [#allocation3], %s417_s15, %s417_s15, %s418_s16  }
   0xd   :  { %412 = dma.done.wait [#allocation3], 256  }
   0xe   :  { %413 = vsyncadd [#allocation3], 4294967040  ;;  %v419_v0 = vmov 1.0   ;;  %v461_v1 = vld [vmem:[#allocation2] sm:$0xff]  ;;  %v30_v2 = vld [vmem:[#allocation2 + $0x8] sm:$0xff]  ;;  %v420_v3 = vmov 0  }
   0xf   :  { %290 = vmatprep.subr.mxu0 %v419_v0  ;;  %325 = vmatprep.subr.mxu1 %v419_v0  ;;  %v252_v22 = vld [vmem:[%s529_s1] ss:$0 sm:$0xff]  ;;  %s421_s22 = smov [#allocation5]  }
  0x10   :  { %291 = vmatpush3.msra.mxu0 %v419_v0  ;;  %326 = vmatpush3.msra.mxu1 %v419_v0  ;;  %v253_v25 = vld [vmem:[%s530_s2] ss:$0 sm:$0xff]  ;;  %s240_s23 = sshll.u32 %s421_s22, 4  ;;  %s241_s23 = int_to_ptr.vmem [resolvable:$true] %s240_s23 }
  0x11   :  { %292 = vmatprep.subr.mxu0 %v419_v0  ;;  %327 = vmatprep.subr.mxu1 %v419_v0  ;;  %s392_s24 = scalar_lea.vmem %s241_s23, 256  ;;  %p397_p6 = scmp.lt.s32.totalorder %s241_s23, %s241_s23 }
  0x12   :  { %293 = vmatpush3.msra.mxu0 %v419_v0  ;;  %328 = vmatpush3.msra.mxu1 %v419_v0  ;;  %p393_p5 = scmp.ne.s32.totalorder %s241_s23, %s392_s24  ;;  %p398_p7 = scmp.lt.s32.totalorder %s392_s24, %s392_s24 }
  0x13   :  { %294 = vmatprep.subr.mxu0 %v419_v0  ;;  %329 = vmatprep.subr.mxu1 %v419_v0 }
  0x14   :  { %295 = vmatpush3.msra.mxu0 %v419_v0  ;;  %330 = vmatpush3.msra.mxu1 %v419_v0  ;;  %p399_p8 = por %p398_p7, %p397_p6 }
  0x15   :  { %296 = vmatprep.subr.mxu0 %v419_v0  ;;  %331 = vmatprep.subr.mxu1 %v419_v0 }
  0x16   :  { %297 = vmatpush3.msra.mxu0 %v419_v0  ;;  %322 = vmatprep.mubr.f32.mxu0 %v461_v1  ;;  %p400_p9 = pnand %p399_p8, %p393_p5 }
  0x17   :  { %298 = vmatprep.subr.mxu0 %v419_v0  ;;  %332 = vmatpush3.msra.mxu1 %v419_v0 }
  0x18   :  { %299 = vmatpush3.msra.mxu0 %v419_v0  ;;  %333 = vmatprep.subr.mxu1 %v419_v0 }
  0x19   :  { %300 = vmatprep.subr.mxu0 %v419_v0  ;;  %334 = vmatpush3.msra.mxu1 %v419_v0 }
  0x1a   :  { %301 = vmatpush3.msra.mxu0 %v419_v0  ;;  %335 = vmatprep.subr.mxu1 %v419_v0 }
  0x1b   :  { %302 = vmatprep.subr.mxu0 %v419_v0  ;;  %336 = vmatpush3.msra.mxu1 %v419_v0 }
  0x1c   :  { %303 = vmatpush3.msra.mxu0 %v419_v0  ;;  %337 = vmatprep.subr.mxu1 %v419_v0 }
  0x1d   :  { %304 = vmatprep.subr.mxu0 %v419_v0  ;;  %338 = vmatpush3.msra.mxu1 %v419_v0 }
  0x1e   :  { %305 = vmatpush3.msra.mxu0 %v419_v0  ;;  %339 = vmatprep.subr.mxu1 %v419_v0 }
  0x1f   :  { %306 = vmatprep.subr.mxu0 %v419_v0  ;;  %340 = vmatpush3.msra.mxu1 %v419_v0 }
  0x20   :  { %307 = vmatpush3.msra.mxu0 %v419_v0  ;;  %341 = vmatprep.subr.mxu1 %v419_v0 }
  0x21   :  { %308 = vmatprep.subr.mxu0 %v419_v0  ;;  %342 = vmatpush3.msra.mxu1 %v419_v0 }
  0x22   :  { %309 = vmatpush3.msra.mxu0 %v419_v0  ;;  %343 = vmatprep.subr.mxu1 %v419_v0 }
  0x23   :  { %310 = vmatprep.subr.mxu0 %v419_v0  ;;  %344 = vmatpush3.msra.mxu1 %v419_v0 }
  0x24   :  { %311 = vmatpush3.msra.mxu0 %v419_v0  ;;  %345 = vmatprep.subr.mxu1 %v419_v0 }
  0x25   :  { %312 = vmatprep.subr.mxu0 %v419_v0  ;;  %346 = vmatpush3.msra.mxu1 %v419_v0 }
  0x26   :  { %313 = vmatpush3.msra.mxu0 %v419_v0  ;;  %347 = vmatprep.subr.mxu1 %v419_v0 }
  0x27   :  { %314 = vmatprep.subr.mxu0 %v419_v0  ;;  %348 = vmatpush3.msra.mxu1 %v419_v0 }
  0x28   :  { %315 = vmatpush3.msra.mxu0 %v419_v0  ;;  %349 = vmatprep.subr.mxu1 %v419_v0 }
  0x29   :  { %316 = vmatprep.subr.mxu0 %v419_v0  ;;  %350 = vmatpush3.msra.mxu1 %v419_v0 }
  0x2a   :  { %317 = vmatpush3.msra.mxu0 %v419_v0  ;;  %351 = vmatprep.subr.mxu1 %v419_v0 }
  0x2b   :  { %318 = vmatprep.subr.mxu0 %v419_v0  ;;  %352 = vmatpush3.msra.mxu1 %v419_v0 }
  0x2c   :  { %319 = vmatpush3.msra.mxu0 %v419_v0  ;;  %353 = vmatprep.subr.mxu1 %v419_v0 }
  0x2d   :  { %320 = vmatprep.subr.mxu0 %v419_v0  ;;  %354 = vmatpush3.msra.mxu1 %v419_v0 }
  0x2e   :  { %321 = vmatpush3.msra.mxu0 %v419_v0  ;;  %355 = vmatprep.subr.mxu1 %v419_v0 }
  0x2f   :  { %323 = vmatmul.mubr.f32.vlgmr.msra.gmra.mxu0 %v30_v2  ;;  %356 = vmatpush3.msra.mxu1 %v419_v0 }
  0x30   :  { %366 = vset.pattern.permute.xlu0 %v420_v3  ;;  %367 = vset.pattern.permute.xlu1 %v420_v3 }
  0xef   :  { %v324_v4 = vpop.f32.mrf.mxu0 }
  0xf0   :  { %v107_v7 = vmul.f32 0.0078125, %v324_v4 }
  0xf1   :  { %v97_v5 = vpop.f32.mrf.mxu0 }
  0xf2   :  { %v106_v6 = vmul.f32 0.0078125, %v97_v5 }
  0xf4   :  { %110 = vperm.xlu0 %366, %v106_v6  }
  0xf8   :  { %115 = vperm.xlu0 %366, %v107_v7  }
 0x16f   :  { %v111_v8 = vpop.permute.xlu0 %110 }
 0x170   :  { %v118_v9 = vsub.f32 %v461_v1, %v111_v8 }
 0x172   :  { %v120_v10 = vmul.f32 %v118_v9, %v118_v9 }
 0x173   :  { %v116_v11 = vpop.permute.xlu0 %115 }
 0x174   :  { %v119_v12 = vsub.f32 %v30_v2, %v116_v11  ;;  %357 = vmatprep.mubr.f32.mxu1 %v120_v10 }
 0x176   :  { %v121_v13 = vmul.f32 %v119_v12, %v119_v12 }
 0x178   :  { %358 = vmatmul.mubr.f32.vlgmr.msra.gmra.mxu1 %v121_v13 }
 0x238   :  { %v359_v14 = vpop.f32.mrf.mxu1 }
 0x239   :  { %v198_v16 = vmul.f32 0.0078125, %v359_v14 }
 0x23a   :  { %v188_v15 = vpop.f32.mrf.mxu1 }
 0x23b   :  { %v197_v17 = vmul.f32 0.0078125, %v188_v15  ;;  %v200_v19 = vadd.f32 1e-12, %v198_v16 }
 0x23d   :  { %v199_v18 = vadd.f32 1e-12, %v197_v17 }
 0x23f   :  { %368 = vrsqrt.f32 %v199_v18 }
 0x240   :  { %370 = vrsqrt.f32 %v200_v19 }
 0x24c   :  { %v369_v20 = vpop.eup %368 }
 0x24d   :  { %205 = vperm.xlu1 %367, %v369_v20   ;;  %v371_v21 = vpop.eup %370 }
 0x251   :  { %210 = vperm.xlu1 %367, %v371_v21  }
 0x2c8   :  { %v206_v23 = vpop.permute.xlu1 %205 }
 0x2c9   :  { %v213_v24 = vmul.f32 %v206_v23, %v118_v9 }
 0x2cb   :  { %v222_v26 = vmul.f32 %v252_v22, %v213_v24 }
 0x2cc   :  { %v211_v27 = vpop.permute.xlu1 %210 }
 0x2cd   :  { %v231_v28 = vadd.f32 %v253_v25, %v222_v26  ;;  %v214_v29 = vmul.f32 %v211_v27, %v119_v12 }
 0x2cf   :  { %233 = vst [vmem:[#allocation5] sm:$0xff] %v231_v28  ;;  %v223_v30 = vmul.f32 %v252_v22, %v214_v29 }
 0x2d1   :  { %v232_v31 = vadd.f32 %v253_v25, %v223_v30 }
 0x2d3   :  { %234 = vst [vmem:[#allocation5 + $0x8] sm:$0xff] %v232_v31 }
 0x2d4   :  { %403 = shalt.err (!%p400_p9)
}
 0x2d5   :  { %246 = dma.vmem_to_hbm [thread:$0]  %s241_s23, 256, %s531_s3, [#allocation4], %s417_s15, %s417_s15, %s418_s16  }
 0x2d6   :  { %414 = dma.done.wait [#allocation4], 256  }
 0x2d7   :  { %415 = vsyncadd [#allocation4], 4294967040 }
 0x2d8   :  { %250 = vsyncpa [#allocation3], 1 }
 0x2d9   :  { %251 = vsyncpa [#allocation4], 1 }

</bundles_post_ra>
